<compile_context>
chip_gen: v5e
topology: v5e:2x2
jax: 0.10.0
libtpu: 0.0.40
codegen_flags: <defaults>
</compile_context>

<pallas_src>
import math

import jax
import jax.numpy as jnp
import numpy as np
from jax.experimental import pallas as pl
from jax.experimental.pallas import tpu as pltpu


def encoder_layer_kernel(x_ref, pos_ref,
                         wq_ref, wk_ref, wv_ref, bq_ref, bk_ref, bv_ref,
                         wo_ref, bo_ref,
                         w1_ref, b1_ref, w2_ref, b2_ref,
                         g1_ref, be1_ref, g2_ref, be2_ref,
                         o_ref, acc_ref):
    h = pl.program_id(1)
    n_heads = pl.num_programs(1)
    hd = wq_ref.shape[1]
    scale = 1.0 / math.sqrt(hd)
    eps = 1e-5
    f32 = jnp.float32
    bf16 = jnp.bfloat16

    def mm(a, b):
        return jnp.dot(a, b, preferred_element_type=f32)

    x = x_ref[...].astype(f32)                         # (S, D)
    pos = pos_ref[...].astype(f32)                     # (S, D)
    qk_in = (x + pos).astype(bf16)                     # q = k = src + pos
    v_in = x.astype(bf16)                              # value input = src

    # --- per-head in-projection (weights pre-sliced by BlockSpec) ---
    q = mm(qk_in, wq_ref[...]) + bq_ref[...]           # (S, hd) f32
    k = mm(qk_in, wk_ref[...]) + bk_ref[...]
    v = mm(v_in, wv_ref[...]) + bv_ref[...]
    q = q * scale                                      # applied once, post-proj

    # --- scaled dot-product attention for this head ---
    s = jax.lax.dot_general(                           # q @ k.T, (S, S) f32
        q.astype(bf16), k.astype(bf16),
        (((1,), (1,)), ((), ())), preferred_element_type=f32)
    s = s - jnp.max(s, axis=-1, keepdims=True)
    p = jnp.exp(s)
    denom = jnp.sum(p, axis=-1, keepdims=True)         # (S, 1) f32
    o_h = mm(p.astype(bf16), v.astype(bf16))           # (S, hd) f32
    o_h = o_h * pl.reciprocal(denom, approx=True)      # normalize small output

    # --- accumulate this head's slice of the output projection ---
    head_proj = mm(o_h.astype(bf16), wo_ref[...])      # (S, D) f32

    @pl.when(h == 0)
    def _init():
        acc_ref[...] = jnp.zeros_like(acc_ref)

    acc_ref[...] += head_proj

    # --- epilogue: residual + LN1 + FFN + residual + LN2 (last head only) ---
    @pl.when(h == n_heads - 1)
    def _epilogue():
        attn = acc_ref[...] + bo_ref[...]
        src1 = x + attn
        mu = jnp.mean(src1, axis=-1, keepdims=True)
        var = jnp.mean((src1 - mu) ** 2, axis=-1, keepdims=True)
        src1 = (src1 - mu) * jax.lax.rsqrt(var + eps) * g1_ref[...] + be1_ref[...]

        h1 = mm(src1.astype(bf16), w1_ref[...]) + b1_ref[...]
        h1 = jnp.maximum(h1, 0.0)
        ffn = mm(h1.astype(bf16), w2_ref[...]) + b2_ref[...]

        src2 = src1 + ffn
        mu2 = jnp.mean(src2, axis=-1, keepdims=True)
        var2 = jnp.mean((src2 - mu2) ** 2, axis=-1, keepdims=True)
        out = (src2 - mu2) * jax.lax.rsqrt(var2 + eps) * g2_ref[...] + be2_ref[...]
        o_ref[...] = out.astype(o_ref.dtype)


def transformer_encoder_layer(src, pos, params, nhead):
    """src, pos: (S, B, D) like PyTorch.  Returns (S, B, D)."""
    S, B, D = src.shape
    hd = D // nhead
    DFF = params['w1_t'].shape[1]

    x = jnp.transpose(src, (1, 0, 2))   # (B, S, D) for the kernel
    p = jnp.transpose(pos, (1, 0, 2))

    tok_spec = lambda: pl.BlockSpec((None, S, D), lambda b, h: (b, 0, 0))
    head_spec = lambda shape: pl.BlockSpec((None,) + shape, lambda b, h: (h, 0, 0))

    def full_spec(shape):
        nd = len(shape)
        return pl.BlockSpec(shape, lambda b, h: (0,) * nd)

    in_specs = [
        tok_spec(), tok_spec(),                         # x, pos
        head_spec((D, hd)), head_spec((D, hd)), head_spec((D, hd)),   # wq, wk, wv
        head_spec((1, hd)), head_spec((1, hd)), head_spec((1, hd)),   # bq, bk, bv
        head_spec((hd, D)),                             # wo (per-head slice)
        full_spec((1, D)),                              # bo
        full_spec((D, DFF)), full_spec((1, DFF)),       # w1, b1
        full_spec((DFF, D)), full_spec((1, D)),         # w2, b2
        full_spec((1, D)), full_spec((1, D)),           # g1, be1
        full_spec((1, D)), full_spec((1, D)),           # g2, be2
    ]

    out = pl.pallas_call(
        encoder_layer_kernel,
        grid=(B, nhead),
        in_specs=in_specs,
        out_specs=pl.BlockSpec((None, S, D), lambda b, h: (b, 0, 0)),
        out_shape=jax.ShapeDtypeStruct((B, S, D), src.dtype),
        scratch_shapes=[pltpu.VMEM((S, D), jnp.float32)],
        compiler_params=pltpu.CompilerParams(
            dimension_semantics=("parallel", "arbitrary"),
            vmem_limit_bytes=48 * 1024 * 1024),
    )(x, p,
      params['wq_h'], params['wk_h'], params['wv_h'],
      params['bq_h'], params['bk_h'], params['bv_h'],
      params['wo_h'], params['bo'],
      params['w1_t'], params['b1'], params['w2_t'], params['b2'],
      params['g1'], params['be1'], params['g2'], params['be2'])
    return jnp.transpose(out, (1, 0, 2))


def make_params(key, d_model, nhead, dim_feedforward):
    ks = jax.random.split(key, 8)
    std = 0.05
    hd = d_model // nhead
    in_proj_w = jax.random.normal(ks[0], (3 * d_model, d_model), jnp.float32) * std
    in_proj_b = jax.random.normal(ks[1], (3 * d_model,), jnp.float32) * std
    out_proj_w = jax.random.normal(ks[2], (d_model, d_model), jnp.float32) * std
    out_proj_b = jax.random.normal(ks[3], (d_model,), jnp.float32) * std
    lin1_w = jax.random.normal(ks[4], (dim_feedforward, d_model), jnp.float32) * std
    lin1_b = jax.random.normal(ks[5], (dim_feedforward,), jnp.float32) * std
    lin2_w = jax.random.normal(ks[6], (d_model, dim_feedforward), jnp.float32) * std
    lin2_b = jax.random.normal(ks[7], (d_model,), jnp.float32) * std

    wq, wk, wv = jnp.split(in_proj_w, 3, axis=0)   # torch (out, in)
    bq, bk, bv = jnp.split(in_proj_b, 3)

    def head_w(w):      # (D_out, D_in) -> (H, D_in, hd), bf16 (MXU operand)
        return jnp.transpose(w.T.reshape(d_model, nhead, hd), (1, 0, 2)).astype(jnp.bfloat16)

    def head_b(b):      # (D,) -> (H, 1, hd), f32
        return b.reshape(nhead, 1, hd).astype(jnp.float32)

    return dict(
        wq_h=head_w(wq), wk_h=head_w(wk), wv_h=head_w(wv),
        bq_h=head_b(bq), bk_h=head_b(bk), bv_h=head_b(bv),
        wo_h=out_proj_w.T.reshape(nhead, hd, d_model).astype(jnp.bfloat16),
        bo=out_proj_b.reshape(1, -1),
        w1_t=lin1_w.T.astype(jnp.bfloat16), b1=lin1_b.reshape(1, -1),
        w2_t=lin2_w.T.astype(jnp.bfloat16), b2=lin2_b.reshape(1, -1),
        g1=jnp.ones((1, d_model), jnp.float32), be1=jnp.zeros((1, d_model), jnp.float32),
        g2=jnp.ones((1, d_model), jnp.float32), be2=jnp.zeros((1, d_model), jnp.float32),
    )


def reference_forward(x_bsd, pos_bsd, params, nhead):
    """Pure-JAX reference ((B,S,D) layout) mirroring PyTorch forward_post in
    eval mode, with the same bf16-matmul / f32-accumulate mixed precision."""
    B, S, D = x_bsd.shape
    hd = D // nhead
    eps = 1e-5
    f32, bf16 = jnp.float32, jnp.bfloat16
    scale = 1.0 / math.sqrt(hd)

    def layer_norm(x, g, b):
        mu = jnp.mean(x, axis=-1, keepdims=True)
        var = jnp.mean((x - mu) ** 2, axis=-1, keepdims=True)
        return (x - mu) * jax.lax.rsqrt(var + eps) * g + b

    qk = (x_bsd + pos_bsd).astype(bf16)
    vin = x_bsd.astype(bf16)

    q = jnp.einsum('bsd,hdf->bhsf', qk, params['wq_h'],
                   preferred_element_type=f32) + params['bq_h'][None]
    k = jnp.einsum('bsd,hdf->bhsf', qk, params['wk_h'],
                   preferred_element_type=f32) + params['bk_h'][None]
    v = jnp.einsum('bsd,hdf->bhsf', vin, params['wv_h'],
                   preferred_element_type=f32) + params['bv_h'][None]
    q = q * scale

    s = jnp.einsum('bhqf,bhkf->bhqk', q.astype(bf16), k.astype(bf16),
                   preferred_element_type=f32)
    s = s - jnp.max(s, axis=-1, keepdims=True)
    p = jnp.exp(s)
    denom = jnp.sum(p, axis=-1, keepdims=True)
    o = jnp.einsum('bhqk,bhkf->bhqf', p.astype(bf16), v.astype(bf16),
                   preferred_element_type=f32) / denom
    attn = jnp.einsum('bhqf,hfd->bqd', o.astype(bf16), params['wo_h'],
                      preferred_element_type=f32) + params['bo']

    src1 = layer_norm(x_bsd + attn, params['g1'], params['be1'])
    h1 = jnp.einsum('bsd,df->bsf', src1.astype(bf16), params['w1_t'],
                    preferred_element_type=f32) + params['b1']
    h1 = jnp.maximum(h1, 0.0)
    ffn = jnp.einsum('bsf,fd->bsd', h1.astype(bf16), params['w2_t'],
                     preferred_element_type=f32) + params['b2']
    return layer_norm(src1 + ffn, params['g2'], params['be2'])


if __name__ == "__main__":
    S, B, D, H, DFF = 8, 2, 32, 4, 64   # small shapes: seq=8, batch=2, d_model=32

    key = jax.random.PRNGKey(0)
    k_src, k_pos, k_par = jax.random.split(key, 3)
    src = jax.random.normal(k_src, (S, B, D), jnp.float32)
    pos = jax.random.normal(k_pos, (S, B, D), jnp.float32)
    params = make_params(k_par, D, H, DFF)

    out = transformer_encoder_layer(src, pos, params, H)
    out = jax.block_until_ready(out)

    ref_bsd = reference_forward(jnp.transpose(src, (1, 0, 2)),
                                jnp.transpose(pos, (1, 0, 2)), params, H)
    ref = jnp.transpose(ref_bsd, (1, 0, 2))
    np.testing.assert_allclose(np.asarray(out), np.asarray(ref), rtol=1e-2, atol=1e-2)

    # TODO(synk): dropout layers are identity here (inference); torch's RNG-based
    # training dropout has no direct deterministic Pallas equivalent.
    print("KERNEL_OK")
</pallas_src>

<mosaic_0001>
module attributes {stable_mosaic.version = 11 : i64} {
  func.func @encoder_layer_kernel(%arg0: i32, %arg1: i32, %arg2: memref<1x8x32xf32, #tpu.memory_space<vmem>>, %arg3: memref<1x8x32xf32, #tpu.memory_space<vmem>>, %arg4: memref<1x32x8xbf16, #tpu.memory_space<vmem>>, %arg5: memref<1x32x8xbf16, #tpu.memory_space<vmem>>, %arg6: memref<1x32x8xbf16, #tpu.memory_space<vmem>>, %arg7: memref<1x1x8xf32, #tpu.memory_space<vmem>>, %arg8: memref<1x1x8xf32, #tpu.memory_space<vmem>>, %arg9: memref<1x1x8xf32, #tpu.memory_space<vmem>>, %arg10: memref<1x8x32xbf16, #tpu.memory_space<vmem>>, %arg11: memref<1x32xf32, #tpu.memory_space<vmem>>, %arg12: memref<32x64xbf16, #tpu.memory_space<vmem>>, %arg13: memref<1x64xf32, #tpu.memory_space<vmem>>, %arg14: memref<64x32xbf16, #tpu.memory_space<vmem>>, %arg15: memref<1x32xf32, #tpu.memory_space<vmem>>, %arg16: memref<1x32xf32, #tpu.memory_space<vmem>>, %arg17: memref<1x32xf32, #tpu.memory_space<vmem>>, %arg18: memref<1x32xf32, #tpu.memory_space<vmem>>, %arg19: memref<1x32xf32, #tpu.memory_space<vmem>>, %arg20: memref<1x8x32xf32, #tpu.memory_space<vmem>>, %arg21: memref<8x32xf32, #tpu.memory_space<vmem>>) attributes {dimension_semantics = [#tpu.dimension_semantics<parallel>, #tpu.dimension_semantics<arbitrary>], iteration_bounds = array<i64: 2, 4>, scalar_prefetch = 0 : i64, scratch_operands = 1 : i64, tpu.core_type = #tpu.core_type<tc>, window_params = [{transform_indices = @transform_0, window_bounds = array<i64: 1, 8, 32>}, {transform_indices = @transform_1, window_bounds = array<i64: 1, 8, 32>}, {transform_indices = @transform_2, window_bounds = array<i64: 1, 32, 8>}, {transform_indices = @transform_3, window_bounds = array<i64: 1, 32, 8>}, {transform_indices = @transform_4, window_bounds = array<i64: 1, 32, 8>}, {transform_indices = @transform_5, window_bounds = array<i64: 1, 1, 8>}, {transform_indices = @transform_6, window_bounds = array<i64: 1, 1, 8>}, {transform_indices = @transform_7, window_bounds = array<i64: 1, 1, 8>}, {transform_indices = @transform_8, window_bounds = array<i64: 1, 8, 32>}, {pipeline_mode = #tpu.pipeline_mode<synchronous>, transform_indices = @transform_9, window_bounds = array<i64: 1, 32>}, {pipeline_mode = #tpu.pipeline_mode<synchronous>, transform_indices = @transform_10, window_bounds = array<i64: 32, 64>}, {pipeline_mode = #tpu.pipeline_mode<synchronous>, transform_indices = @transform_11, window_bounds = array<i64: 1, 64>}, {pipeline_mode = #tpu.pipeline_mode<synchronous>, transform_indices = @transform_12, window_bounds = array<i64: 64, 32>}, {pipeline_mode = #tpu.pipeline_mode<synchronous>, transform_indices = @transform_13, window_bounds = array<i64: 1, 32>}, {pipeline_mode = #tpu.pipeline_mode<synchronous>, transform_indices = @transform_14, window_bounds = array<i64: 1, 32>}, {pipeline_mode = #tpu.pipeline_mode<synchronous>, transform_indices = @transform_15, window_bounds = array<i64: 1, 32>}, {pipeline_mode = #tpu.pipeline_mode<synchronous>, transform_indices = @transform_16, window_bounds = array<i64: 1, 32>}, {pipeline_mode = #tpu.pipeline_mode<synchronous>, transform_indices = @transform_17, window_bounds = array<i64: 1, 32>}, {transform_indices = @transform_18, window_bounds = array<i64: 1, 8, 32>}]} {
    %c0 = arith.constant 0 : index
    %c0_0 = arith.constant 0 : index
    %c0_1 = arith.constant 0 : index
    %0 = vector.load %arg2[%c0, %c0_0, %c0_1] : memref<1x8x32xf32, #tpu.memory_space<vmem>>, vector<1x8x32xf32>
    %1 = vector.shape_cast %0 : vector<1x8x32xf32> to vector<8x32xf32>
    %c0_2 = arith.constant 0 : index
    %c0_3 = arith.constant 0 : index
    %c0_4 = arith.constant 0 : index
    %2 = vector.load %arg3[%c0_2, %c0_3, %c0_4] : memref<1x8x32xf32, #tpu.memory_space<vmem>>, vector<1x8x32xf32>
    %3 = vector.shape_cast %2 : vector<1x8x32xf32> to vector<8x32xf32>
    %4 = arith.addf %1, %3 : vector<8x32xf32>
    %5 = arith.truncf %4 : vector<8x32xf32> to vector<8x32xbf16>
    %6 = arith.truncf %1 : vector<8x32xf32> to vector<8x32xbf16>
    %c0_5 = arith.constant 0 : index
    %c0_6 = arith.constant 0 : index
    %c0_7 = arith.constant 0 : index
    %7 = vector.load %arg4[%c0_5, %c0_6, %c0_7] : memref<1x32x8xbf16, #tpu.memory_space<vmem>>, vector<1x32x8xbf16>
    %8 = vector.shape_cast %7 : vector<1x32x8xbf16> to vector<32x8xbf16>
    %cst = arith.constant dense<0.000000e+00> : vector<8x8xf32>
    %9 = tpu.matmul %5, %8, %cst {dimension_numbers = #tpu.dot_dimension_numbers<[1], [0], [0], [1], [0, 0, 1, 1], [], []>} : vector<8x32xbf16>, vector<32x8xbf16>, vector<8x8xf32> -> vector<8x8xf32>
    %c0_8 = arith.constant 0 : index
    %c0_9 = arith.constant 0 : index
    %c0_10 = arith.constant 0 : index
    %10 = vector.load %arg7[%c0_8, %c0_9, %c0_10] : memref<1x1x8xf32, #tpu.memory_space<vmem>>, vector<1x1x8xf32>
    %11 = vector.shape_cast %10 : vector<1x1x8xf32> to vector<1x8xf32>
    %12 = vector.broadcast %11 : vector<1x8xf32> to vector<8x8xf32>
    %13 = arith.addf %9, %12 : vector<8x8xf32>
    %c0_11 = arith.constant 0 : index
    %c0_12 = arith.constant 0 : index
    %c0_13 = arith.constant 0 : index
    %14 = vector.load %arg5[%c0_11, %c0_12, %c0_13] : memref<1x32x8xbf16, #tpu.memory_space<vmem>>, vector<1x32x8xbf16>
    %15 = vector.shape_cast %14 : vector<1x32x8xbf16> to vector<32x8xbf16>
    %cst_14 = arith.constant dense<0.000000e+00> : vector<8x8xf32>
    %16 = tpu.matmul %5, %15, %cst_14 {dimension_numbers = #tpu.dot_dimension_numbers<[1], [0], [0], [1], [0, 0, 1, 1], [], []>} : vector<8x32xbf16>, vector<32x8xbf16>, vector<8x8xf32> -> vector<8x8xf32>
    %c0_15 = arith.constant 0 : index
    %c0_16 = arith.constant 0 : index
    %c0_17 = arith.constant 0 : index
    %17 = vector.load %arg8[%c0_15, %c0_16, %c0_17] : memref<1x1x8xf32, #tpu.memory_space<vmem>>, vector<1x1x8xf32>
    %18 = vector.shape_cast %17 : vector<1x1x8xf32> to vector<1x8xf32>
    %19 = vector.broadcast %18 : vector<1x8xf32> to vector<8x8xf32>
    %20 = arith.addf %16, %19 : vector<8x8xf32>
    %c0_18 = arith.constant 0 : index
    %c0_19 = arith.constant 0 : index
    %c0_20 = arith.constant 0 : index
    %21 = vector.load %arg6[%c0_18, %c0_19, %c0_20] : memref<1x32x8xbf16, #tpu.memory_space<vmem>>, vector<1x32x8xbf16>
    %22 = vector.shape_cast %21 : vector<1x32x8xbf16> to vector<32x8xbf16>
    %cst_21 = arith.constant dense<0.000000e+00> : vector<8x8xf32>
    %23 = tpu.matmul %6, %22, %cst_21 {dimension_numbers = #tpu.dot_dimension_numbers<[1], [0], [0], [1], [0, 0, 1, 1], [], []>} : vector<8x32xbf16>, vector<32x8xbf16>, vector<8x8xf32> -> vector<8x8xf32>
    %c0_22 = arith.constant 0 : index
    %c0_23 = arith.constant 0 : index
    %c0_24 = arith.constant 0 : index
    %24 = vector.load %arg9[%c0_22, %c0_23, %c0_24] : memref<1x1x8xf32, #tpu.memory_space<vmem>>, vector<1x1x8xf32>
    %25 = vector.shape_cast %24 : vector<1x1x8xf32> to vector<1x8xf32>
    %26 = vector.broadcast %25 : vector<1x8xf32> to vector<8x8xf32>
    %27 = arith.addf %23, %26 : vector<8x8xf32>
    %cst_25 = arith.constant 0.353553385 : f32
    %28 = vector.broadcast %cst_25 : f32 to vector<8x8xf32>
    %29 = arith.mulf %13, %28 : vector<8x8xf32>
    %30 = arith.truncf %29 : vector<8x8xf32> to vector<8x8xbf16>
    %31 = arith.truncf %20 : vector<8x8xf32> to vector<8x8xbf16>
    %cst_26 = arith.constant dense<0.000000e+00> : vector<8x8xf32>
    %32 = tpu.matmul %30, %31, %cst_26 {dimension_numbers = #tpu.dot_dimension_numbers<[1], [1], [0], [0], [0, 0, 1, 0], [], []>} : vector<8x8xbf16>, vector<8x8xbf16>, vector<8x8xf32> -> vector<8x8xf32>
    %cst_27 = arith.constant dense<0xFF800000> : vector<8xf32>
    %33 = vector.multi_reduction <maximumf>, %32, %cst_27 [1] : vector<8x8xf32> to vector<8xf32>
    %34 = vector.shape_cast %33 : vector<8xf32> to vector<8x1xf32>
    %35 = vector.broadcast %34 : vector<8x1xf32> to vector<8x8xf32>
    %36 = arith.subf %32, %35 : vector<8x8xf32>
    %37 = math.exp %36 : vector<8x8xf32>
    %cst_28 = arith.constant dense<0.000000e+00> : vector<8xf32>
    %38 = vector.multi_reduction <add>, %37, %cst_28 [1] : vector<8x8xf32> to vector<8xf32>
    %39 = vector.shape_cast %38 : vector<8xf32> to vector<8x1xf32>
    %40 = arith.truncf %37 : vector<8x8xf32> to vector<8x8xbf16>
    %41 = arith.truncf %27 : vector<8x8xf32> to vector<8x8xbf16>
    %cst_29 = arith.constant dense<0.000000e+00> : vector<8x8xf32>
    %42 = tpu.matmul %40, %41, %cst_29 {dimension_numbers = #tpu.dot_dimension_numbers<[1], [0], [0], [1], [0, 0, 1, 1], [], []>} : vector<8x8xbf16>, vector<8x8xbf16>, vector<8x8xf32> -> vector<8x8xf32>
    %43 = tpu.reciprocal %39 {approx = true} : vector<8x1xf32> -> vector<8x1xf32>
    %44 = vector.broadcast %43 : vector<8x1xf32> to vector<8x8xf32>
    %45 = arith.mulf %42, %44 : vector<8x8xf32>
    %46 = arith.truncf %45 : vector<8x8xf32> to vector<8x8xbf16>
    %c0_30 = arith.constant 0 : index
    %c0_31 = arith.constant 0 : index
    %c0_32 = arith.constant 0 : index
    %47 = vector.load %arg10[%c0_30, %c0_31, %c0_32] : memref<1x8x32xbf16, #tpu.memory_space<vmem>>, vector<1x8x32xbf16>
    %48 = vector.shape_cast %47 : vector<1x8x32xbf16> to vector<8x32xbf16>
    %cst_33 = arith.constant dense<0.000000e+00> : vector<8x32xf32>
    %49 = tpu.matmul %46, %48, %cst_33 {dimension_numbers = #tpu.dot_dimension_numbers<[1], [0], [0], [1], [0, 0, 1, 1], [], []>} : vector<8x8xbf16>, vector<8x32xbf16>, vector<8x32xf32> -> vector<8x32xf32>
    %c0_i32 = arith.constant 0 : i32
    %50 = arith.cmpi eq, %arg1, %c0_i32 : i32
    %51 = arith.extui %50 : i1 to i32
    %c0_i32_34 = arith.constant 0 : i32
    %52 = arith.cmpi ne, %51, %c0_i32_34 : i32
    scf.if %52 {
      %cst_40 = arith.constant 0.000000e+00 : f32
      %59 = vector.broadcast %cst_40 : f32 to vector<8x32xf32>
      %c0_41 = arith.constant 0 : index
      %c0_42 = arith.constant 0 : index
      %60 = vector.load %arg21[%c0_41, %c0_42] : memref<8x32xf32, #tpu.memory_space<vmem>>, vector<8x32xf32>
      tpu.vector_store %arg21[%c0_41, %c0_42], %59 {strides = array<i32>} : memref<8x32xf32, #tpu.memory_space<vmem>>, vector<8x32xf32>,
    } else {
    }
    %c0_35 = arith.constant 0 : index
    %c0_36 = arith.constant 0 : index
    %53 = vector.load %arg21[%c0_35, %c0_36] : memref<8x32xf32, #tpu.memory_space<vmem>>, vector<8x32xf32>
    %54 = arith.addf %53, %49 : vector<8x32xf32>
    %c0_37 = arith.constant 0 : index
    %c0_38 = arith.constant 0 : index
    %55 = vector.load %arg21[%c0_37, %c0_38] : memref<8x32xf32, #tpu.memory_space<vmem>>, vector<8x32xf32>
    tpu.vector_store %arg21[%c0_37, %c0_38], %54 {strides = array<i32>} : memref<8x32xf32, #tpu.memory_space<vmem>>, vector<8x32xf32>,
    %c3_i32 = arith.constant 3 : i32
    %56 = arith.cmpi eq, %arg1, %c3_i32 : i32
    %57 = arith.extui %56 : i1 to i32
    %c0_i32_39 = arith.constant 0 : i32
    %58 = arith.cmpi ne, %57, %c0_i32_39 : i32
    scf.if %58 {
      %c0_40 = arith.constant 0 : index
      %c0_41 = arith.constant 0 : index
      %59 = vector.load %arg21[%c0_40, %c0_41] : memref<8x32xf32, #tpu.memory_space<vmem>>, vector<8x32xf32>
      %c0_42 = arith.constant 0 : index
      %c0_43 = arith.constant 0 : index
      %60 = vector.load %arg11[%c0_42, %c0_43] : memref<1x32xf32, #tpu.memory_space<vmem>>, vector<1x32xf32>
      %61 = vector.broadcast %60 : vector<1x32xf32> to vector<8x32xf32>
      %62 = arith.addf %59, %61 : vector<8x32xf32>
      %63 = arith.addf %1, %62 : vector<8x32xf32>
      %cst_44 = arith.constant dense<0.000000e+00> : vector<8xf32>
      %64 = vector.multi_reduction <add>, %63, %cst_44 [1] : vector<8x32xf32> to vector<8xf32>
      %65 = vector.shape_cast %64 : vector<8xf32> to vector<8x1xf32>
      %cst_45 = arith.constant 3.200000e+01 : f32
      %66 = vector.broadcast %cst_45 : f32 to vector<8x1xf32>
      %67 = arith.divf %65, %66 : vector<8x1xf32>
      %68 = vector.broadcast %67 : vector<8x1xf32> to vector<8x32xf32>
      %69 = arith.subf %63, %68 : vector<8x32xf32>
      %70 = arith.mulf %69, %69 : vector<8x32xf32>
      %cst_46 = arith.constant dense<0.000000e+00> : vector<8xf32>
      %71 = vector.multi_reduction <add>, %70, %cst_46 [1] : vector<8x32xf32> to vector<8xf32>
      %72 = vector.shape_cast %71 : vector<8xf32> to vector<8x1xf32>
      %cst_47 = arith.constant 3.200000e+01 : f32
      %73 = vector.broadcast %cst_47 : f32 to vector<8x1xf32>
      %74 = arith.divf %72, %73 : vector<8x1xf32>
      %75 = vector.broadcast %67 : vector<8x1xf32> to vector<8x32xf32>
      %76 = arith.subf %63, %75 : vector<8x32xf32>
      %cst_48 = arith.constant 9.99999974E-6 : f32
      %77 = vector.broadcast %cst_48 : f32 to vector<8x1xf32>
      %78 = arith.addf %74, %77 : vector<8x1xf32>
      %79 = math.rsqrt %78 : vector<8x1xf32>
      %80 = vector.broadcast %79 : vector<8x1xf32> to vector<8x32xf32>
      %81 = arith.mulf %76, %80 : vector<8x32xf32>
      %c0_49 = arith.constant 0 : index
      %c0_50 = arith.constant 0 : index
      %82 = vector.load %arg16[%c0_49, %c0_50] : memref<1x32xf32, #tpu.memory_space<vmem>>, vector<1x32xf32>
      %83 = vector.broadcast %82 : vector<1x32xf32> to vector<8x32xf32>
      %84 = arith.mulf %81, %83 : vector<8x32xf32>
      %c0_51 = arith.constant 0 : index
      %c0_52 = arith.constant 0 : index
      %85 = vector.load %arg17[%c0_51, %c0_52] : memref<1x32xf32, #tpu.memory_space<vmem>>, vector<1x32xf32>
      %86 = vector.broadcast %85 : vector<1x32xf32> to vector<8x32xf32>
      %87 = arith.addf %84, %86 : vector<8x32xf32>
      %88 = arith.truncf %87 : vector<8x32xf32> to vector<8x32xbf16>
      %c0_53 = arith.constant 0 : index
      %c0_54 = arith.constant 0 : index
      %89 = vector.load %arg12[%c0_53, %c0_54] : memref<32x64xbf16, #tpu.memory_space<vmem>>, vector<32x64xbf16>
      %cst_55 = arith.constant dense<0.000000e+00> : vector<8x64xf32>
      %90 = tpu.matmul %88, %89, %cst_55 {dimension_numbers = #tpu.dot_dimension_numbers<[1], [0], [0], [1], [0, 0, 1, 1], [], []>} : vector<8x32xbf16>, vector<32x64xbf16>, vector<8x64xf32> -> vector<8x64xf32>
      %c0_56 = arith.constant 0 : index
      %c0_57 = arith.constant 0 : index
      %91 = vector.load %arg13[%c0_56, %c0_57] : memref<1x64xf32, #tpu.memory_space<vmem>>, vector<1x64xf32>
      %92 = vector.broadcast %91 : vector<1x64xf32> to vector<8x64xf32>
      %93 = arith.addf %90, %92 : vector<8x64xf32>
      %cst_58 = arith.constant 0.000000e+00 : f32
      %94 = vector.broadcast %cst_58 : f32 to vector<8x64xf32>
      %95 = arith.maximumf %93, %94 : vector<8x64xf32>
      %96 = arith.truncf %95 : vector<8x64xf32> to vector<8x64xbf16>
      %c0_59 = arith.constant 0 : index
      %c0_60 = arith.constant 0 : index
      %97 = vector.load %arg14[%c0_59, %c0_60] : memref<64x32xbf16, #tpu.memory_space<vmem>>, vector<64x32xbf16>
      %cst_61 = arith.constant dense<0.000000e+00> : vector<8x32xf32>
      %98 = tpu.matmul %96, %97, %cst_61 {dimension_numbers = #tpu.dot_dimension_numbers<[1], [0], [0], [1], [0, 0, 1, 1], [], []>} : vector<8x64xbf16>, vector<64x32xbf16>, vector<8x32xf32> -> vector<8x32xf32>
      %c0_62 = arith.constant 0 : index
      %c0_63 = arith.constant 0 : index
      %99 = vector.load %arg15[%c0_62, %c0_63] : memref<1x32xf32, #tpu.memory_space<vmem>>, vector<1x32xf32>
      %100 = vector.broadcast %99 : vector<1x32xf32> to vector<8x32xf32>
      %101 = arith.addf %98, %100 : vector<8x32xf32>
      %102 = arith.addf %87, %101 : vector<8x32xf32>
      %cst_64 = arith.constant dense<0.000000e+00> : vector<8xf32>
      %103 = vector.multi_reduction <add>, %102, %cst_64 [1] : vector<8x32xf32> to vector<8xf32>
      %104 = vector.shape_cast %103 : vector<8xf32> to vector<8x1xf32>
      %cst_65 = arith.constant 3.200000e+01 : f32
      %105 = vector.broadcast %cst_65 : f32 to vector<8x1xf32>
      %106 = arith.divf %104, %105 : vector<8x1xf32>
      %107 = vector.broadcast %106 : vector<8x1xf32> to vector<8x32xf32>
      %108 = arith.subf %102, %107 : vector<8x32xf32>
      %109 = arith.mulf %108, %108 : vector<8x32xf32>
      %cst_66 = arith.constant dense<0.000000e+00> : vector<8xf32>
      %110 = vector.multi_reduction <add>, %109, %cst_66 [1] : vector<8x32xf32> to vector<8xf32>
      %111 = vector.shape_cast %110 : vector<8xf32> to vector<8x1xf32>
      %cst_67 = arith.constant 3.200000e+01 : f32
      %112 = vector.broadcast %cst_67 : f32 to vector<8x1xf32>
      %113 = arith.divf %111, %112 : vector<8x1xf32>
      %114 = vector.broadcast %106 : vector<8x1xf32> to vector<8x32xf32>
      %115 = arith.subf %102, %114 : vector<8x32xf32>
      %cst_68 = arith.constant 9.99999974E-6 : f32
      %116 = vector.broadcast %cst_68 : f32 to vector<8x1xf32>
      %117 = arith.addf %113, %116 : vector<8x1xf32>
      %118 = math.rsqrt %117 : vector<8x1xf32>
      %119 = vector.broadcast %118 : vector<8x1xf32> to vector<8x32xf32>
      %120 = arith.mulf %115, %119 : vector<8x32xf32>
      %c0_69 = arith.constant 0 : index
      %c0_70 = arith.constant 0 : index
      %121 = vector.load %arg18[%c0_69, %c0_70] : memref<1x32xf32, #tpu.memory_space<vmem>>, vector<1x32xf32>
      %122 = vector.broadcast %121 : vector<1x32xf32> to vector<8x32xf32>
      %123 = arith.mulf %120, %122 : vector<8x32xf32>
      %c0_71 = arith.constant 0 : index
      %c0_72 = arith.constant 0 : index
      %124 = vector.load %arg19[%c0_71, %c0_72] : memref<1x32xf32, #tpu.memory_space<vmem>>, vector<1x32xf32>
      %125 = vector.broadcast %124 : vector<1x32xf32> to vector<8x32xf32>
      %126 = arith.addf %123, %125 : vector<8x32xf32>
      %c0_73 = arith.constant 0 : index
      %c0_74 = arith.constant 0 : index
      %c0_75 = arith.constant 0 : index
      %127 = vector.load %arg20[%c0_73, %c0_74, %c0_75] : memref<1x8x32xf32, #tpu.memory_space<vmem>>, vector<1x8x32xf32>
      %128 = vector.shape_cast %127 : vector<1x8x32xf32> to vector<8x32xf32>
      %129 = vector.shape_cast %126 : vector<8x32xf32> to vector<1x8x32xf32>
      tpu.vector_store %arg20[%c0_73, %c0_74, %c0_75], %129 {strides = array<i32>} : memref<1x8x32xf32, #tpu.memory_space<vmem>>, vector<1x8x32xf32>,
    } else {
    }
    return
  }
  func.func @transform_0(%arg0: i32, %arg1: i32) -> (i32, i32, i32) {
    %c0_i32 = arith.constant 0 : i32
    %c0_i32_0 = arith.constant 0 : i32
    %c0_i32_1 = arith.constant 0 : i32
    return %arg0, %c0_i32, %c0_i32_0 : i32, i32, i32
  }
  func.func @transform_1(%arg0: i32, %arg1: i32) -> (i32, i32, i32) {
    %c0_i32 = arith.constant 0 : i32
    %c0_i32_0 = arith.constant 0 : i32
    %c0_i32_1 = arith.constant 0 : i32
    return %arg0, %c0_i32, %c0_i32_0 : i32, i32, i32
  }
  func.func @transform_2(%arg0: i32, %arg1: i32) -> (i32, i32, i32) {
    %c0_i32 = arith.constant 0 : i32
    %c0_i32_0 = arith.constant 0 : i32
    %c0_i32_1 = arith.constant 0 : i32
    return %arg1, %c0_i32, %c0_i32_0 : i32, i32, i32
  }
  func.func @transform_3(%arg0: i32, %arg1: i32) -> (i32, i32, i32) {
    %c0_i32 = arith.constant 0 : i32
    %c0_i32_0 = arith.constant 0 : i32
    %c0_i32_1 = arith.constant 0 : i32
    return %arg1, %c0_i32, %c0_i32_0 : i32, i32, i32
  }
  func.func @transform_4(%arg0: i32, %arg1: i32) -> (i32, i32, i32) {
    %c0_i32 = arith.constant 0 : i32
    %c0_i32_0 = arith.constant 0 : i32
    %c0_i32_1 = arith.constant 0 : i32
    return %arg1, %c0_i32, %c0_i32_0 : i32, i32, i32
  }
  func.func @transform_5(%arg0: i32, %arg1: i32) -> (i32, i32, i32) {
    %c0_i32 = arith.constant 0 : i32
    %c0_i32_0 = arith.constant 0 : i32
    %c0_i32_1 = arith.constant 0 : i32
    return %arg1, %c0_i32, %c0_i32_0 : i32, i32, i32
  }
  func.func @transform_6(%arg0: i32, %arg1: i32) -> (i32, i32, i32) {
    %c0_i32 = arith.constant 0 : i32
    %c0_i32_0 = arith.constant 0 : i32
    %c0_i32_1 = arith.constant 0 : i32
    return %arg1, %c0_i32, %c0_i32_0 : i32, i32, i32
  }
  func.func @transform_7(%arg0: i32, %arg1: i32) -> (i32, i32, i32) {
    %c0_i32 = arith.constant 0 : i32
    %c0_i32_0 = arith.constant 0 : i32
    %c0_i32_1 = arith.constant 0 : i32
    return %arg1, %c0_i32, %c0_i32_0 : i32, i32, i32
  }
  func.func @transform_8(%arg0: i32, %arg1: i32) -> (i32, i32, i32) {
    %c0_i32 = arith.constant 0 : i32
    %c0_i32_0 = arith.constant 0 : i32
    %c0_i32_1 = arith.constant 0 : i32
    return %arg1, %c0_i32, %c0_i32_0 : i32, i32, i32
  }
  func.func @transform_9(%arg0: i32, %arg1: i32) -> (i32, i32) {
    %c0_i32 = arith.constant 0 : i32
    %c0_i32_0 = arith.constant 0 : i32
    %c0_i32_1 = arith.constant 0 : i32
    return %c0_i32, %c0_i32_0 : i32, i32
  }
  func.func @transform_10(%arg0: i32, %arg1: i32) -> (i32, i32) {
    %c0_i32 = arith.constant 0 : i32
    %c0_i32_0 = arith.constant 0 : i32
    %c0_i32_1 = arith.constant 0 : i32
    return %c0_i32, %c0_i32_0 : i32, i32
  }
  func.func @transform_11(%arg0: i32, %arg1: i32) -> (i32, i32) {
    %c0_i32 = arith.constant 0 : i32
    %c0_i32_0 = arith.constant 0 : i32
    %c0_i32_1 = arith.constant 0 : i32
    return %c0_i32, %c0_i32_0 : i32, i32
  }
  func.func @transform_12(%arg0: i32, %arg1: i32) -> (i32, i32) {
    %c0_i32 = arith.constant 0 : i32
    %c0_i32_0 = arith.constant 0 : i32
    %c0_i32_1 = arith.constant 0 : i32
    return %c0_i32, %c0_i32_0 : i32, i32
  }
  func.func @transform_13(%arg0: i32, %arg1: i32) -> (i32, i32) {
    %c0_i32 = arith.constant 0 : i32
    %c0_i32_0 = arith.constant 0 : i32
    %c0_i32_1 = arith.constant 0 : i32
    return %c0_i32, %c0_i32_0 : i32, i32
  }
  func.func @transform_14(%arg0: i32, %arg1: i32) -> (i32, i32) {
    %c0_i32 = arith.constant 0 : i32
    %c0_i32_0 = arith.constant 0 : i32
    %c0_i32_1 = arith.constant 0 : i32
    return %c0_i32, %c0_i32_0 : i32, i32
  }
  func.func @transform_15(%arg0: i32, %arg1: i32) -> (i32, i32) {
    %c0_i32 = arith.constant 0 : i32
    %c0_i32_0 = arith.constant 0 : i32
    %c0_i32_1 = arith.constant 0 : i32
    return %c0_i32, %c0_i32_0 : i32, i32
  }
  func.func @transform_16(%arg0: i32, %arg1: i32) -> (i32, i32) {
    %c0_i32 = arith.constant 0 : i32
    %c0_i32_0 = arith.constant 0 : i32
    %c0_i32_1 = arith.constant 0 : i32
    return %c0_i32, %c0_i32_0 : i32, i32
  }
  func.func @transform_17(%arg0: i32, %arg1: i32) -> (i32, i32) {
    %c0_i32 = arith.constant 0 : i32
    %c0_i32_0 = arith.constant 0 : i32
    %c0_i32_1 = arith.constant 0 : i32
    return %c0_i32, %c0_i32_0 : i32, i32
  }
  func.func @transform_18(%arg0: i32, %arg1: i32) -> (i32, i32, i32) {
    %c0_i32 = arith.constant 0 : i32
    %c0_i32_0 = arith.constant 0 : i32
    %c0_i32_1 = arith.constant 0 : i32
    return %arg0, %c0_i32, %c0_i32_0 : i32, i32, i32
  }
}

</mosaic_0001>

<bundles_post_ra>
// kernel: tpu_custom_call.1
= control target key start
LH: loop header
LB: loop body
LE: loop exit
PB: predicated region body
PF: predicated region fallthrough
CT: control target
= control target key end

     0   :  { %s1868_s0 = inlined_call_operand.vmem [shape: f32[2,8,32], index: 0, kind: input, shape index: {}]   ;;  %s1869_s1 = inlined_call_operand.vmem [shape: f32[2,8,32], index: 1, kind: input, shape index: {}]   ;;  %s1870_s2 = inlined_call_operand.vmem [shape: bf16[4,32,8], index: 2, kind: input, shape index: {}]   ;;  %s1871_s3 = inlined_call_operand.vmem [shape: bf16[4,32,8], index: 3, kind: input, shape index: {}]   ;;  %s1872_s4 = inlined_call_operand.vmem [shape: bf16[4,32,8], index: 4, kind: input, shape index: {}]   ;;  %s1873_s5 = inlined_call_operand.vmem [shape: f32[4,1,8], index: 5, kind: input, shape index: {}]   ;;  %s1874_s6 = inlined_call_operand.vmem [shape: f32[4,1,8], index: 6, kind: input, shape index: {}]   ;;  %s1875_s7 = inlined_call_operand.vmem [shape: f32[4,1,8], index: 7, kind: input, shape index: {}]   ;;  %s1876_s8 = inlined_call_operand.vmem [shape: bf16[4,8,32], index: 8, kind: input, shape index: {}]   ;;  %s1877_s9 = inlined_call_operand.vmem [shape: f32[1,32], index: 9, kind: input, shape index: {}]   ;;  %s1878_s10 = inlined_call_operand.vmem [shape: bf16[32,64], index: 10, kind: input, shape index: {}]   ;;  %s1879_s11 = inlined_call_operand.vmem [shape: f32[1,64], index: 11, kind: input, shape index: {}]   ;;  %s1880_s12 = inlined_call_operand.vmem [shape: bf16[64,32], index: 12, kind: input, shape index: {}]   ;;  %s1881_s13 = inlined_call_operand.vmem [shape: f32[1,32], index: 13, kind: input, shape index: {}]   ;;  %s1882_s14 = inlined_call_operand.vmem [shape: f32[1,32], index: 14, kind: input, shape index: {}]   ;;  %s1883_s15 = inlined_call_operand.vmem [shape: f32[1,32], index: 15, kind: input, shape index: {}]   ;;  %s1884_s16 = inlined_call_operand.vmem [shape: f32[1,32], index: 16, kind: input, shape index: {}]   ;;  %s1885_s17 = inlined_call_operand.vmem [shape: f32[1,32], index: 17, kind: input, shape index: {}]   ;;  %s1886_s18 = inlined_call_operand.hbm [shape: f32[2,8,32], index: 18, kind: output, shape index: {}]  }
   0x1   :  { %1901 = sst [smem:[#allocation18_spill]] %s1868_s0 }
   0x2   :  { %1902 = sst [smem:[#allocation19_spill]] %s1869_s1 }
   0x3   :  { %1903 = sst [smem:[#allocation20_spill]] %s1870_s2 }
   0x4   :  { %1904 = sst [smem:[#allocation21_spill]] %s1873_s5 }
   0x5   :  { %1905 = sst [smem:[#allocation22_spill]] %s1879_s11 }
   0x6   :  { %1906 = sst [smem:[#allocation23_spill]] %s1881_s13 }
   0x7   :  { %1907 = sst [smem:[#allocation24_spill]] %s1883_s15 }
   0x8   :  { %1908 = sst [smem:[#allocation25_spill]] %s1884_s16 }
   0x9   :  { %1909 = sst [smem:[#allocation26_spill]] %s1885_s17 }
   0xa   :  { %1910 = sst [smem:[#allocation27_spill]] %s1886_s18 }
   0xb   :  { %23 = vsyncpa [#allocation4], 0 }
   0xc   :  { %25 = vsyncpa [#allocation4 + $0x1], 0  ;;  %s1643_s27 = smov 0   ;;  %s1645_s28 = smov 0  }
   0xd   :  { %s1647_s29 = smov 0   ;;  %s1649_s30 = smov 0  }
   0xe   :  { %s1651_s0 = smov 0   ;;  %s1653_s19 = smov 0  }
   0xf   :  { %s1655_s1 = smov 0   ;;  %s1657_s20 = smov 0  }
  0x10 LB: > { %1911 = sst [smem:[#allocation6_spill]] %s1516_s27  ;;  %s1265_s21 = sadd.s32 4294967295, %s1544_s20   ;;  %s1544_s20 = sphi %s1657_s20, %s31_s20   ;;  %s1540_s1 = sphi %s1655_s1, %s1949_s1   ;;  %s1536_s19 = sphi %s1653_s19, %s1948_s19   ;;  %s1532_s0 = sphi %s1651_s0, %s1947_s0   ;;  %s1528_s30 = sphi %s1649_s30, %s1946_s30   ;;  %s1524_s29 = sphi %s1647_s29, %s1945_s29   ;;  %s1520_s28 = sphi %s1645_s28, %s1944_s28   ;;  %s1516_s27 = sphi %s1643_s27, %s1943_s27  }
  0x11   : > { %1912 = sst [smem:[#allocation7_spill]] %s1520_s28  ;;  %s1266_s22 = sadd.s32 4294967294, %s1544_s20  }
  0x12   : > { %1913 = sst [smem:[#allocation8_spill]] %s1524_s29  ;;  %s40_s2 = sadd.s32 1, %s1536_s19 }
  0x13   : > { %1914 = sst [smem:[#allocation9_spill]] %s1532_s0  ;;  %p41_p0 = scmp.ge.s32.totalorder %s40_s2, 4 }
  0x14   : > { %1915 = sst [smem:[#allocation10_spill]] %s1536_s19  ;;  %s43_s23 = sadd.s32 1, %s1540_s1 }
  0x15   : > { %1916 = sst [smem:[#allocation11_spill]] %s1540_s1  ;;  %p483_p1 = scmp.ne.s32.totalorder %s1524_s29, %s1520_s28 }
  0x16   : > { %1917 = sst [smem:[#allocation12_spill]] %s1544_s20  ;;  %p484_p2 = scmp.eq.s32.totalorder %s1265_s21, 7 }
  0x17   : > { %s1951_s2 = smov (%p41_p0, %s40_s2), 0  ;;  %s1953_s23 = smov (!%p41_p0, %s43_s23), %s1540_s1 }
  0x18   : > { %1918 = sst [smem:[#allocation13_spill]] %s1951_s2  ;;  %p1692_p3 = por %p484_p2, %p483_p1 }
  0x19   : > { %p489_p4 = scmp.ne.s32.totalorder %s1520_s28, %s1516_s27  ;;  %p45_p5 = scmp.ge.s32.totalorder %s1953_s23, 2 }
  0x1a   : > { %s1919_s24 = scalar_select %p1692_p3, 1, 0 }
  0x1b   : > { %p490_p6 = scmp.eq.s32.totalorder %s1266_s22, 7  ;;  %p1269_p7 = scmp.ge.s32.totalorder %s1544_s20, 1 }
  0x1c   : > { %1920 = sst [smem:[#allocation14_spill]] %s1919_s24  ;;  %p598_p8 = scmp.lt.s32.totalorder %s1544_s20, 9 }
  0x1d   : > { %s1955_s23 = smov (%p45_p5, %s1953_s23), 0  ;;  %p1702_p9 = por %p490_p6, %p489_p4 }
  0x1e   : > { %1921 = sst [smem:[#allocation15_spill]] %s1955_s23  ;;  %p599_p10 = pnand %p1269_p7, %p598_p8 }
  0x1f   : > { %s1922_s25 = scalar_select %p1702_p9, 1, 0 }
  0x20   : > { %s470_s26 = ssub.s32 %s1540_s1, %s1955_s23  ;;  %s473_s21 = sadd.s32 1, %s1524_s29 }
  0x21   : > { %1923 = sst [smem:[#allocation16_spill]] %s1922_s25  ;;  %p471_p11 = scmp.eq.s32.totalorder %s470_s26, 0 }
  0x22   : > { %602 = sbr.rel (%p599_p10) target bundleno = 1566 (0x61e), region = 92  ;;  %s1899_s22 = sand.u32 (!%p599_p10), 1, %s1520_s28  }
  0x23   : > { %s1710_s2 = scalar_select %p471_p11, %s1524_s29, %s473_s21  }
  0x24   : > { %p691_p12 = scmp.lt.s32.totalorder (!%p599_p10), %s1528_s30, 3  ;;  %s1716_s19 = sshll.u32 (!%p599_p10), %s1899_s22, 3 }
  0x25   : > { %1924 = sst [smem:[#allocation17_spill]] %s1710_s2  ;;  %p683_p13 = scmp.lt.s32.totalorder (!%p599_p10), %s1532_s0, 1 }
  0x26   : > { %s1925_s5 = sld [smem:[#allocation21_spill]] (!%p599_p10)  ;;  %s682_s24 = scalar_lea.vmem (!%p599_p10), [#allocation3], %s1716_s19 }
  0x27   : > { %s1720_s25 = scalar_select %p691_p12, %s1528_s30, 3  ;;  %vm745_vm0 = vcmask 261120   ;;  %vm834_vm1 = vcmask 64512   ;;  %vm868_vm2 = vcmask 1043456  }
  0x28   : > { %s684_s26 = scalar_select %p683_p13, %s1532_s0, 1 }
  0x29   : > { %s1342_s21 = sshll.u32 %s1720_s25, 4  ;;  %s1926_s20 = sld [smem:[#allocation20_spill]] }
  0x2a   : > { %s700_s22 = scalar_lea.vmem %s1871_s3, %s1342_s21  ;;  %s1271_s17 = sshll.u32 %s684_s26, 3 }
  0x2b   : > { %v1348_v1 = vld [vmem:[%s700_s22 + $0x8] sm:$0xff]  ;;  %s1927_s13 = sld [smem:[#allocation18_spill]]  ;;  %v1347_v3 = vld [vmem:[%s700_s22] sm:$0xff]  ;;  %s1279_s29 = sshll.u32 %s1720_s25, 2 }
  0x2c   : > { %s708_s2 = scalar_lea.vmem %s1925_s5, %s1720_s25  ;;  %s1928_s23 = sld [smem:[#allocation19_spill]]  ;;  %788 = vmatpush.bf16.msra.mxu1 %v1348_v1 }
  0x2d   : > { %v1430_v11 = vld [vmem:[%s708_s2] ss:$0 sm:$0xff]  ;;  %s718_s2 = scalar_lea.vmem %s1876_s8, %s1279_s29  ;;  %p1310_p0 = scmp.ne.s32.totalorder %s1528_s30, 0 }
  0x2e   : > { %v888_v32 = vld [vmem:[%s718_s2] sm:$0xf] }
  0x2f   : > { %s695_s18 = scalar_lea.vmem %s1926_s20, %s1342_s21  ;;  %v893_v33 = vsel %vm868_vm2, %v888_v32, 0 }
  0x30   : > { %v1346_v0 = vld [vmem:[%s695_s18 + $0x8] sm:$0xff]  ;;  %v1345_v2 = vld [vmem:[%s695_s18] sm:$0xff]  ;;  %s711_s18 = scalar_lea.vmem %s1874_s6, %s1720_s25  ;;  %789 = vmatpush.bf16.msra.mxu1 %v1347_v3 }
  0x31   : > { %s686_s11 = scalar_lea.vmem %s1927_s13, %s1271_s17  ;;  %755 = vmatpush.bf16.msra.mxu0 %v1346_v0  ;;  %v1431_v12 = vld [vmem:[%s711_s18] ss:$0 sm:$0xff] }
  0x32   : > { %s690_s5 = scalar_lea.vmem %s1928_s23, %s1271_s17  ;;  %v1740_v4 = vld [vmem:[%s686_s11] sm:$0xff]  ;;  %s705_s11 = scalar_lea.vmem %s1872_s4, %s1342_s21 }
  0x33   : > { %v721_v5 = vld [vmem:[%s690_s5] sm:$0xff]  ;;  %v1350_v8 = vld [vmem:[%s705_s11 + $0x8] sm:$0xff]  ;;  %v724_v10 = vpack.c.bf16 %v1740_v4, %v1740_v4  ;;  %s714_s17 = scalar_lea.vmem %s1875_s7, %s1720_s25 }
  0x34   : > { %v722_v6 = vadd.f32 %v721_v5, %v1740_v4  ;;  %824 = vmatpush.bf16.msra.mxu2 %v1350_v8  ;;  %v1349_v9 = vld [vmem:[%s705_s11] sm:$0xff]  ;;  %902 = vmatpush.bf16.msrb.mxu1 %v893_v33 }
  0x35   : > { %756 = vmatpush.bf16.msra.mxu0 %v1345_v2  ;;  %v1432_v23 = vld [vmem:[%s714_s17] ss:$0 sm:$0xff] }
  0x36   : > { %v723_v7 = vpack.c.bf16 %v722_v6, %v722_v6 }
  0x38   : > { %1288 = vmatmul.msk.bf16.vlgmr.msra.gmra.mxu0 %vm745_vm0, %v723_v7  ;;  %1297 = vmatmul.msk.bf16.vlgmr.msra.gmra.mxu1 %vm745_vm0, %v723_v7 }
  0x39   : > { %825 = vmatpush.bf16.msra.mxu2 %v1349_v9 }
  0x3c   : > { %1306 = vmatmul.msk.bf16.vlgmr.msra.gmra.mxu2 %vm745_vm0, %v724_v10 }
  0xb5   : > { %v758_v13 = vpop.f32.mrf.mxu0  ;;  %v791_v14 = vpop.f32.mrf.mxu1 }
  0xb6   : > { %v759_v15 = vadd.f32 %v1430_v11, %v758_v13  ;;  %v792_v16 = vadd.f32 %v1431_v12, %v791_v14 }
  0xb8   : > { %v833_v17 = vpack.c.bf16 %v792_v16, %v792_v16  ;;  %v831_v18 = vmul.f32 0.35355338, %v759_v15 }
  0xba   : > { %v839_v19 = vsel %vm834_vm1, %v833_v17, 0  ;;  %v832_v22 = vpack.c.bf16 %v831_v18, %v831_v18 }
  0xbb   : > { %848 = vmatpush.bf16.xpose.msra.mxu3 %v839_v19 }
  0xbd   : > { %v760_v20 = vpop.f32.mrf.mxu0  ;;  %v793_v21 = vpop.f32.mrf.mxu1 }
  0xbf   : > { %v827_v24 = vpop.f32.mrf.mxu2 }
  0xc0   : > { %v828_v25 = vadd.f32 %v1432_v23, %v827_v24 }
  0xc2   : > { %1307 = vmatmul.msk.bf16.vlgmr.msra.gmra.mxu3 %vm834_vm1, %v832_v22  ;;  %v864_v26 = vpack.c.bf16 %v828_v25, %v828_v25 }
  0xc4   : > { %v870_v27 = vsel %vm868_vm2, %v864_v26, 0 }
  0xc5   : > { %879 = vmatpush.bf16.msrb.mxu0 %v870_v27 }
  0xc7   : > { %v829_v28 = vpop.f32.mrf.mxu2 }
 0x145   : > { %v850_v29 = vpop.f32.mrf.mxu3 }
 0x146   : > { %v854_v30 = vsel %vm834_vm1, %v850_v29, -inf }
 0x147   : > { %855 = vmax.xlane.f32.xlu0 %v854_v30 }
 0x14d   : > { %v852_v31 = vpop.f32.mrf.mxu3 }
 0x1ba   : > { %v856_v34 = vpop.xlane.xlu0 %855 }
 0x1bb   : > { %v857_v35 = vsub.f32 %v850_v29, %v856_v34 }
 0x1bd   : > { %v858_v36 = vmul.f32 1.442695, %v857_v35 }
 0x1bf   : > { %1433 = vpow2.f32 %v858_v36 }
 0x1c5   : > { %v1434_v37 = vpop.eup %1433 }
 0x1c6   : > { %v860_v38 = vsel %vm834_vm1, %v1434_v37, 0.0  ;;  %v863_v39 = vpack.c.bf16 %v1434_v37, %v1434_v37 }
 0x1c7   : > { %861 = vadd.xlane.f32.xlu0 %v860_v38 }
 0x1c8   : > { %1308 = vmatmul.msk.bf16.vlgmr.msrb.gmra.mxu0 %vm834_vm1, %v863_v39 }
 0x23a   : > { %v862_v40 = vpop.xlane.xlu0 %861 }
 0x23b   : > { %1435 = vrcp.f32 %v862_v40 }
 0x241   : > { %v1436_v41 = vpop.eup %1435 }
 0x245   : > { %v881_v42 = vpop.f32.mrf.mxu0 }
 0x246   : > { %v886_v43 = vmul.f32 %v1436_v41, %v881_v42 }
 0x248   : > { %v887_v44 = vpack.c.bf16 %v886_v43, %v886_v43 }
 0x24a   : > { %1309 = vmatmul.msk.bf16.vlgmr.msrb.gmra.mxu1 %vm834_vm1, %v887_v44 }
 0x24d   : > { %v883_v45 = vpop.f32.mrf.mxu0 }
 0x2c7   : > { %v904_v46 = vpop.f32.mrf.mxu1 }
 0x2cb   : > { %911 = sbr.rel (%p1310_p0) target bundleno = 722 (0x2d2), region = 96 }
 0x2cf   : > { %v906_v47 = vpop.f32.mrf.mxu1 }
 0x2d0   : > { %v1546_v48 = vmov 0.0  }
 0x2d1   : > { %912 = vst.msk [vmem:[#allocation2] sm:$0xff] %vm745_vm0, %v1546_v48 }
 0x2d2 PF: > { %p1311_p1 = scmp.ne.s32.totalorder %s1528_s30, 3 }
 0x2d3   : > { %s1929_s16 = sld [smem:[#allocation24_spill]] (!%p1311_p1) }
 0x2d4   : > { %s1930_s22 = sld [smem:[#allocation22_spill]] (!%p1311_p1) }
 0x2d5   : > { %s1931_s21 = sld [smem:[#allocation23_spill]] (!%p1311_p1) }
 0x2d6   : > { %s1932_s27 = sld [smem:[#allocation25_spill]] (!%p1311_p1) }
 0x2d7   : > { %919 = sbr.rel (%p1311_p1) target bundleno = 1544 (0x608), region = 100  ;;  %s1933_s13 = sld [smem:[#allocation26_spill]] (!%p1311_p1) }
 0x2d8   : > { %v913_v49 = vld [vmem:[#allocation2] sm:$0xff] }
 0x2d9   : > { %v914_v50 = vadd.f32 %v913_v49, %v904_v46 }
 0x2db   : > { %915 = vst.msk [vmem:[#allocation2] sm:$0xff] %vm745_vm0, %v914_v50 }
 0x2dc   : > { %v1437_v52 = vld [vmem:[%s1877_s9] ss:$0 sm:$0xff]  ;;  %v1547_v56 = vmov 32.0   ;;  %v1356_v6 = vld [vmem:[%s1880_s12 + $0x18] sm:$0xff]  ;;  %v1355_v9 = vld [vmem:[%s1880_s12 + $0x10] sm:$0xff]  ;;  %vm1041_vm7 = vcmask 523264  }
 0x2dd   : > { %1444 = vrcp.f32 %v1547_v56  ;;  %v1351_v5 = vld [vmem:[%s1878_s10] sm:$0xff]  ;;  %1049 = vmatpush.bf16.msra.mxu1 %v1356_v6  ;;  %v1354_v24 = vld [vmem:[%s1880_s12 + $0x8] sm:$0xff] }
 0x2de   : > { %v1438_v17 = vld [vmem:[%s1882_s14] ss:$0 sm:$0xff] }
 0x2df   : > { %v1439_v20 = vld [vmem:[%s1929_s16] ss:$0 sm:$0xff] }
 0x2e0   : > { %v1353_v25 = vld [vmem:[%s1880_s12] sm:$0xff] }
 0x2e1   : > { %1050 = vmatpush.bf16.msra.mxu1 %v1355_v9  ;;  %v1440_v26 = vld [vmem:[%s1930_s22] ss:$0 sm:$0xff] }
 0x2e2   : > { %v920_v51 = vld [vmem:[#allocation2] sm:$0xff] }
 0x2e3   : > { %v925_v53 = vadd.f32 %v1437_v52, %v920_v51  ;;  %v1445_v57 = vpop.eup %1444  ;;  %v1441_v32 = vld [vmem:[%s1931_s21] ss:$0 sm:$0xff] }
 0x2e4   : > { %v931_v58 = vmul.f32 32.0, %v1445_v57  ;;  %vm935_vm3 = vweird.f32 %v1445_v57  ;;  %v1442_v52 = vld [vmem:[%s1932_s27] ss:$0 sm:$0xff] }
 0x2e5   : > { %v926_v54 = vadd.f32 %v925_v53, %v1740_v4  ;;  %v1352_v4 = vld [vmem:[%s1878_s10 + $0x8] sm:$0xff]  ;;  %1051 = vmatpush.bf16.msra.mxu1 %v1354_v24 }
 0x2e6   : > { %v932_v59 = vsub.f32 1.0, %v931_v58  ;;  %996 = vmatpush.bf16.msra.mxu0 %v1352_v4 }
 0x2e7   : > { %v927_v55 = vsel %vm745_vm0, %v926_v54, 0.0 }
 0x2e8   : > { %928 = vadd.xlane.f32.xlu0 %v927_v55  ;;  %v933_v60 = vmul.f32 %v1445_v57, %v932_v59 }
 0x2e9   : > { %1052 = vmatpush.bf16.msra.mxu1 %v1353_v25 }
 0x2ea   : > { %v934_v61 = vadd.f32 %v1445_v57, %v933_v60  ;;  %997 = vmatpush.bf16.msra.mxu0 %v1351_v5 }
 0x2ec   : > { %v936_v62 = vsel %vm935_vm3, %v1445_v57, %v934_v61 }
 0x35b   : > { %v929_v63 = vpop.xlane.xlu0 %928 }
 0x35c   : > { %v937_v0 = vmul.f32 %v936_v62, %v929_v63 }
 0x35e   : > { %v938_v1 = vsub.f32 %v926_v54, %v937_v0  ;;  %v1443_v54 = vld [vmem:[%s1933_s13] ss:$0 sm:$0xff] }
 0x360   : > { %v939_v2 = vmul.f32 %v938_v1, %v938_v1 }
 0x362   : > { %v940_v3 = vsel %vm745_vm0, %v939_v2, 0.0 }
 0x363   : > { %941 = vadd.xlane.f32.xlu0 %v940_v3 }
 0x3d6   : > { %v942_v7 = vpop.xlane.xlu0 %941 }
 0x3d7   : > { %v943_v8 = vmul.f32 %v942_v7, %v936_v62 }
 0x3d9   : > { %v944_v10 = vadd.f32 1e-05, %v943_v8 }
 0x3db   : > { %1446 = vrsqrt.f32 %v944_v10  ;;  %vm951_vm5 = vweird.f32 %v944_v10 }
 0x3e1   : > { %v1447_v11 = vpop.eup %1446 }
 0x3e2   : > { %v946_v12 = vmul.f32 %v1447_v11, %v944_v10  ;;  %vm952_vm4 = vweird.f32 %v1447_v11 }
 0x3e3   : > { %vm953_vm6 = vmor %vm951_vm5, %vm952_vm4 }
 0x3e4   : > { %v947_v13 = vmul.f32 %v1447_v11, %v946_v12 }
 0x3e6   : > { %v948_v14 = vmul.f32 0.5, %v947_v13 }
 0x3e8   : > { %v949_v15 = vsub.f32 1.5, %v948_v14 }
 0x3ea   : > { %v950_v16 = vmul.f32 %v1447_v11, %v949_v15 }
 0x3ec   : > { %v954_v18 = vsel %vm953_vm6, %v1447_v11, %v950_v16 }
 0x3ed   : > { %v955_v19 = vmul.f32 %v954_v18, %v938_v1 }
 0x3ef   : > { %v960_v21 = vmul.f32 %v1438_v17, %v955_v19 }
 0x3f1   : > { %v965_v22 = vadd.f32 %v1439_v20, %v960_v21 }
 0x3f3   : > { %v966_v23 = vpack.c.bf16 %v965_v22, %v965_v22 }
 0x3f5   : > { %1320 = vmatmul.msk.bf16.vlgmr.msra.gmra.mxu0 %vm745_vm0, %v966_v23 }
 0x472   : > { %v999_v27 = vpop.f32.mrf.mxu0 }
 0x473   : > { %v1000_v28 = vadd.f32 %v1440_v26, %v999_v27 }
 0x475   : > { %v1003_v29 = vmax.f32 %v1000_v28, 0.0 }
 0x477   : > { %v1004_v30 = vpack.c.bf16 %v1003_v29, %v1003_v29 }
 0x479   : > { %1337 = vmatmul.msk.bf16.vlgmr.msra.gmra.mxu1 %vm1041_vm7, %v1004_v30 }
 0x47a   : > { %v1001_v31 = vpop.f32.mrf.mxu0 }
 0x4f6   : > { %v1054_v33 = vpop.f32.mrf.mxu1 }
 0x4f7   : > { %v1055_v34 = vadd.f32 %v1441_v32, %v1054_v33 }
 0x4f9   : > { %v1058_v35 = vadd.f32 %v1055_v34, %v965_v22 }
 0x4fb   : > { %v1059_v36 = vsel %vm745_vm0, %v1058_v35, 0.0 }
 0x4fc   : > { %1060 = vadd.xlane.f32.xlu1 %v1059_v36 }
 0x4fe   : > { %v1056_v37 = vpop.f32.mrf.mxu1 }
 0x56f   : > { %v1061_v38 = vpop.xlane.xlu1 %1060 }
 0x570   : > { %v1062_v39 = vmul.f32 %v1061_v38, %v936_v62 }
 0x572   : > { %v1063_v40 = vsub.f32 %v1058_v35, %v1062_v39 }
 0x574   : > { %v1064_v41 = vmul.f32 %v1063_v40, %v1063_v40 }
 0x576   : > { %v1065_v42 = vsel %vm745_vm0, %v1064_v41, 0.0 }
 0x577   : > { %1066 = vadd.xlane.f32.xlu1 %v1065_v42 }
 0x5ea   : > { %v1067_v43 = vpop.xlane.xlu1 %1066 }
 0x5eb   : > { %v1068_v44 = vmul.f32 %v1067_v43, %v936_v62 }
 0x5ed   : > { %v1069_v45 = vadd.f32 1e-05, %v1068_v44 }
 0x5ef   : > { %1448 = vrsqrt.f32 %v1069_v45  ;;  %vm1076_vm9 = vweird.f32 %v1069_v45 }
 0x5f5   : > { %v1449_v46 = vpop.eup %1448 }
 0x5f6   : > { %v1071_v47 = vmul.f32 %v1449_v46, %v1069_v45  ;;  %vm1077_vm8 = vweird.f32 %v1449_v46 }
 0x5f7   : > { %vm1078_vm10 = vmor %vm1076_vm9, %vm1077_vm8 }
 0x5f8   : > { %v1072_v48 = vmul.f32 %v1449_v46, %v1071_v47 }
 0x5fa   : > { %v1073_v49 = vmul.f32 0.5, %v1072_v48 }
 0x5fc   : > { %v1074_v50 = vsub.f32 1.5, %v1073_v49 }
 0x5fe   : > { %v1075_v51 = vmul.f32 %v1449_v46, %v1074_v50 }
 0x600   : > { %v1079_v53 = vsel %vm1078_vm10, %v1449_v46, %v1075_v51 }
 0x601   : > { %v1080_v55 = vmul.f32 %v1079_v53, %v1063_v40 }
 0x603   : > { %v1085_v56 = vmul.f32 %v1442_v52, %v1080_v55 }
 0x605   : > { %v1090_v57 = vadd.f32 %v1443_v54, %v1085_v56 }
 0x607   : > { %1091 = vst.msk [vmem:[%s682_s24] sm:$0xff] %vm745_vm0, %v1090_v57 }
 0x608 PF: > { %s1934_s15 = sld [smem:[#allocation9_spill]]  ;;  %s1105_s25 = sshll.u32 %s682_s24, 4  ;;  %s1106_s25 = int_to_ptr.vmem [resolvable:$true] %s1105_s25 }
 0x609   : > { %s1935_s11 = sld [smem:[#allocation7_spill]] }
 0x60a   : > { %s1937_s0 = sld [smem:[#allocation27_spill]] }
 0x60e   : > { %s1339_s16 = sshll.u32 %s1934_s15, 3 }
 0x60f   : > { %s1939_s30 = sand.u32 1, %s1935_s11  }
 0x610   : > { %s1938_s2 = smov %s1937_s0  ;;  %s1103_s20 = scalar_lea.hbm %s1937_s0, %s1339_s16 }
 0x611   : > { %s1107_s22 = sshll.u32 %s1103_s20, 4  ;;  %s1093_s26 = scalar_lea.sflag [#allocation4], %s1939_s30  ;;  %s1108_s22 = int_to_ptr.hbm [resolvable:$true] %s1107_s22 }
 0x612   : > { %s1464_s21 = sshra.s32 %s1108_s22, 4  ;;  %s1470_s28 = scalar_lea.hbm %s1938_s2, 16  ;;  %s1465_s21 = int_to_ptr.hbm [resolvable:$true] %s1464_s21 }
 0x613   : > { %s1466_s1 = scalar_lea.hbm %s1465_s21, 8  ;;  %p1471_p6 = scmp.lt.s32.totalorder %s1465_s21, %s1938_s2 }
 0x614   : > { %p1467_p2 = scmp.ne.s32.totalorder %s1465_s21, %s1466_s1  ;;  %p1472_p7 = scmp.lt.s32.totalorder %s1470_s28, %s1466_s1 }
 0x616   : > { %p1468_p4 = pnand %p1467_p2, %p1692_p3  ;;  %p1473_p8 = por %p1472_p7, %p1471_p6 }
 0x618   : > { %p1469_p5 = pneg %p1468_p4 }
 0x61a   : > { %p1474_p10 = pnand %p1473_p8, %p1469_p5 }
 0x61c   : > { %1477 = shalt.err (!%p1474_p10)
}
 0x61d   : > { %1357 = dma.vmem_to_hbm [thread:$0]  (%p1692_p3), %s1106_s25, 128, %s1108_s22, %s1093_s26  }
 0x61e PF: > { %s1940_s19 = sld [smem:[#allocation12_spill]] }
 0x61f   : > { %s1941_s24 = sld [smem:[#allocation6_spill]] }
 0x624   : > { %p1363_p11 = scmp.ge.s32.totalorder %s1940_s19, 2 }
 0x625   : > { %s1119_s11 = sand.u32 1, %s1941_s24  }
 0x626   : > { %p1360_p12 = pnand %p1363_p11, %p1702_p9  ;;  %s1120_s16 = scalar_lea.sflag [#allocation4], %s1119_s11 }
 0x628   : > { %p1361_p13 = pneg %p1360_p12 }
 0x62a   : > { %1511 = dma.done.wait (%p1361_p13), %s1120_s16, 128  }
 0x62b   : > { %1513 = vsyncadd (%p1361_p13), %s1120_s16, 4294967168  ;;  %s31_s20 = sadd.s32 1, %s1940_s19   ;;  %s1943_s27 = sld [smem:[#allocation7_spill]] }
 0x62c   : > { %p28_p0 = scmp.ge.s32.totalorder %s31_s20, 10   ;;  %s1944_s28 = sld [smem:[#allocation8_spill]] }
 0x62d   : > { %s1945_s29 = sld [smem:[#allocation17_spill]] }
 0x62e   : > { %s1946_s30 = sld [smem:[#allocation10_spill]]  ;;  %30 = sbr.rel (!%p28_p0) target bundleno = 16 (0x10), region = 159 }
 0x62f   : > { %s1947_s0 = sld [smem:[#allocation11_spill]] }
 0x630   : > { %s1948_s19 = sld [smem:[#allocation13_spill]] }
 0x631   : > { %s1949_s1 = sld [smem:[#allocation15_spill]] }
 0x633   :  { %1126 = vsyncpa [#allocation4], 1 }
 0x634   :  { %1128 = vsyncpa [#allocation4 + $0x1], 1 }

</bundles_post_ra>
